<compile_context>
chip_gen: v7x
topology: tpu7x:2x2x1
jax: 0.10.0
libtpu: 0.0.40
codegen_flags: <defaults>
</compile_context>

<pallas_src>
import jax
import jax.numpy as jnp
from jax.experimental import pallas as pl
from jax.experimental.pallas import tpu as pltpu


_VMEM_FALLBACK = 32 * 1024 * 1024


def _vmem_limit_bytes():
    """Generation-aware scoped-VMEM limit: ~75% of physical, capped at 100MiB."""
    try:
        cap = pltpu.get_tpu_info().vmem_capacity_bytes
    except Exception:
        return _VMEM_FALLBACK
    return int(min(cap * 3 // 4, 100 * 1024 * 1024))


def _conv_stats_kernel(x_ref, w_ref, st_ref):
    """Per-sample: relu + two 1x1 stride-2 convs + per-channel (mean, M2).

    x_ref:  [2, C_in, S]   (phase 0 feeds conv1, phase 1 feeds conv2)
    w_ref:  [2, C_half, C_in]
    st_ref: [C_out, 2]     column 0 = per-sample mean, column 1 = centered M2
    """
    c_half = w_ref.shape[1]
    inv_s = 1.0 / x_ref.shape[-1]

    x0 = jnp.maximum(x_ref[0], 0.0)
    x1 = jnp.maximum(x_ref[1], 0.0)
    y1 = jnp.dot(w_ref[0], x0, preferred_element_type=jnp.float32)  # [C_half, S]
    y2 = jnp.dot(w_ref[1], x1, preferred_element_type=jnp.float32)

    m1 = jnp.sum(y1, axis=1, keepdims=True) * inv_s                 # [C_half, 1]
    m2 = jnp.sum(y2, axis=1, keepdims=True) * inv_s
    d1 = y1 - m1
    d2 = y2 - m2

    st_ref[:c_half, 0:1] = m1
    st_ref[c_half:, 0:1] = m2
    st_ref[:c_half, 1:2] = jnp.sum(d1 * d1, axis=1, keepdims=True)
    st_ref[c_half:, 1:2] = jnp.sum(d2 * d2, axis=1, keepdims=True)


def _conv_bn_kernel(x_ref, w_ref, b_ref, o_ref):
    """Per-sample: relu + conv with BN-folded weights + bias.

    x_ref: [2, C_in, S]; w_ref: [2, C_half, C_in]; b_ref: [2, C_half, 1]
    o_ref: [C_out, S]  (== the NCHW block (1, C_out, H_out, W_out) flattened)
    """
    c_half = w_ref.shape[1]
    x0 = jnp.maximum(x_ref[0], 0.0)
    x1 = jnp.maximum(x_ref[1], 0.0)
    o_ref[:c_half, :] = (
        jnp.dot(w_ref[0], x0, preferred_element_type=jnp.float32) + b_ref[0])
    o_ref[c_half:, :] = (
        jnp.dot(w_ref[1], x1, preferred_element_type=jnp.float32) + b_ref[1])


def factorized_reduce(x, w1, w2, gamma, beta, eps=1e-5):
    """x: [N, C_in, H, W] float32 (NCHW). w1/w2: [C_out//2, C_in, 1, 1]."""
    n, c_in, h, w = x.shape
    c_half = w1.shape[0]
    c_out = 2 * c_half
    h_out = (h + 1) // 2
    w_out = (w + 1) // 2
    s = h_out * w_out            # per-sample output spatial size
    m = n * s                    # total elements per output channel

    x = x.astype(jnp.float32)
    if (h % 2) or (w % 2):
        # Zero pad to even H/W: relu(0)=0 and conv(0)=0, so the odd/odd phase
        # reproduces PyTorch's ZeroPad2d((0,1,0,1)) path exactly.
        x = jnp.pad(x, ((0, 0), (0, 0), (0, h % 2), (0, w % 2)))

    # Single layout pass: keep ONLY the two stride-2 phases that are used.
    # Phase 0 = (even,even) -> conv1;  phase 1 = (odd,odd) -> conv2.
    v = x.reshape(n, c_in, h_out, 2, w_out, 2)
    x_ph = jnp.stack([v[:, :, :, 0, :, 0], v[:, :, :, 1, :, 1]], axis=0)
    x_ph = x_ph.reshape(2, n, c_in, s)                       # [2, N, C_in, S]

    w_comb = jnp.stack([w1.reshape(c_half, c_in),
                        w2.reshape(c_half, c_in)], axis=0).astype(jnp.float32)

    vmem_limit = _vmem_limit_bytes()
    x_spec = pl.BlockSpec((2, None, c_in, s), lambda i: (0, i, 0, 0))
    w_spec = pl.BlockSpec((2, c_half, c_in), lambda i: (0, 0, 0))

    # ---- Pass 1: per-sample partial BatchNorm statistics --------------------
    stats = pl.pallas_call(
        _conv_stats_kernel,
        out_shape=jax.ShapeDtypeStruct((n, c_out, 2), jnp.float32),
        grid=(n,),
        in_specs=[x_spec, w_spec],
        out_specs=pl.BlockSpec((None, c_out, 2), lambda i: (i, 0, 0)),
        compiler_params=pltpu.CompilerParams(
            dimension_semantics=("parallel",),
            vmem_limit_bytes=vmem_limit),
        cost_estimate=pl.CostEstimate(
            flops=2 * m * c_in * c_out + 8 * m * c_out,
            transcendentals=0,
            bytes_accessed=4 * (2 * m * c_in + 2 * n * c_out + c_out * c_in)),
    )(x_ph, w_comb)

    # ---- Merge partials (Chan) + fold BN into conv weights -------------------
    mean_t = stats[:, :, 0]                                   # [N, C_out]
    m2_t = stats[:, :, 1]                                     # [N, C_out]
    mean = jnp.mean(mean_t, axis=0)                           # [C_out]
    m2 = jnp.sum(m2_t, axis=0) + s * jnp.sum((mean_t - mean) ** 2, axis=0)
    var = jnp.maximum(m2 / m, 0.0)                            # biased batch var
    inv_std = jax.lax.rsqrt(var + eps)
    scale = gamma.astype(jnp.float32) * inv_std               # [C_out]
    shift = beta.astype(jnp.float32) - mean * scale           # [C_out]
    w_folded = w_comb * scale.reshape(2, c_half, 1)
    bias = shift.reshape(2, c_half, 1)
    # TODO(synk): BatchNorm2d running_mean/running_var buffer updates are not
    # produced (the training-mode output value does not depend on them).

    # ---- Pass 2: recompute conv with folded weights, write NCHW directly ----
    out = pl.pallas_call(
        _conv_bn_kernel,
        out_shape=jax.ShapeDtypeStruct((n, c_out, s), jnp.float32),
        grid=(n,),
        in_specs=[x_spec, w_spec,
                  pl.BlockSpec((2, c_half, 1), lambda i: (0, 0, 0))],
        out_specs=pl.BlockSpec((None, c_out, s), lambda i: (i, 0, 0)),
        compiler_params=pltpu.CompilerParams(
            dimension_semantics=("parallel",),
            vmem_limit_bytes=vmem_limit),
        cost_estimate=pl.CostEstimate(
            flops=2 * m * c_in * c_out + 2 * m * c_out,
            transcendentals=0,
            bytes_accessed=4 * (2 * m * c_in + m * c_out + c_out * (c_in + 1))),
    )(x_ph, w_folded, bias)

    # [N, C_out, S] is per-sample channel-major == NCHW: free (metadata) reshape.
    return out.reshape(n, c_out, h_out, w_out)


if __name__ == "__main__":
    key = jax.random.PRNGKey(0)
    k1, k2, k3 = jax.random.split(key, 3)

    n, c_in, h, w = 2, 4, 16, 16
    c_out = 8

    x = jax.random.normal(k1, (n, c_in, h, w), dtype=jnp.float32)
    # Synthetic conv weights (nn.Conv2d(..., 1, stride=2, bias=False) shapes).
    w1 = 0.1 * jax.random.normal(k2, (c_out // 2, c_in, 1, 1), dtype=jnp.float32)
    w2 = 0.1 * jax.random.normal(k3, (c_out // 2, c_in, 1, 1), dtype=jnp.float32)
    # BatchNorm2d default init: weight=1, bias=0.
    gamma = jnp.ones((c_out,), dtype=jnp.float32)
    beta = jnp.zeros((c_out,), dtype=jnp.float32)

    fr = jax.jit(factorized_reduce)
    out = jax.block_until_ready(fr(x, w1, w2, gamma, beta))

    # Pure-JAX reference for verification.
    xr = jnp.maximum(x, 0.0)
    y1 = jnp.einsum('ncij,kc->nkij', xr[:, :, ::2, ::2],
                    w1.reshape(c_out // 2, c_in))
    xs = jnp.pad(xr[:, :, 1:, 1:], ((0, 0), (0, 0), (0, 1), (0, 1)))
    y2 = jnp.einsum('ncij,kc->nkij', xs[:, :, ::2, ::2],
                    w2.reshape(c_out // 2, c_in))
    y = jnp.concatenate([y1, y2], axis=1)
    mean = y.mean(axis=(0, 2, 3), keepdims=True)
    var = y.var(axis=(0, 2, 3), keepdims=True)
    ref = ((y - mean) * jax.lax.rsqrt(var + 1e-5)
           * gamma.reshape(1, -1, 1, 1) + beta.reshape(1, -1, 1, 1))

    assert out.shape == (n, c_out, h // 2, w // 2), out.shape
    err = float(jnp.max(jnp.abs(out - ref)))
    assert err < 1e-4, err
    print("KERNEL_OK")
</pallas_src>

<mosaic_0001>
module attributes {stable_mosaic.version = 11 : i64} {
  func.func @_conv_stats_kernel(%arg0: i32, %arg1: memref<2x1x4x64xf32, #tpu.memory_space<vmem>>, %arg2: memref<2x4x4xf32, #tpu.memory_space<vmem>>, %arg3: memref<1x8x2xf32, #tpu.memory_space<vmem>>) attributes {dimension_semantics = [#tpu.dimension_semantics<parallel>], iteration_bounds = array<i64: 2>, scalar_prefetch = 0 : i64, scratch_operands = 0 : i64, tpu.core_type = #tpu.core_type<tc>, window_params = [{transform_indices = @transform_0, window_bounds = array<i64: 2, 1, 4, 64>}, {pipeline_mode = #tpu.pipeline_mode<synchronous>, transform_indices = @transform_1, window_bounds = array<i64: 2, 4, 4>}, {transform_indices = @transform_2, window_bounds = array<i64: 1, 8, 2>}]} {
    %c0 = arith.constant 0 : index
    %c0_0 = arith.constant 0 : index
    %c0_1 = arith.constant 0 : index
    %c0_2 = arith.constant 0 : index
    %0 = vector.load %arg1[%c0, %c0_0, %c0_1, %c0_2] : memref<2x1x4x64xf32, #tpu.memory_space<vmem>>, vector<1x1x4x64xf32>
    %1 = vector.shape_cast %0 : vector<1x1x4x64xf32> to vector<4x64xf32>
    %cst = arith.constant 0.000000e+00 : f32
    %2 = vector.broadcast %cst : f32 to vector<4x64xf32>
    %3 = arith.maximumf %1, %2 : vector<4x64xf32>
    %c1 = arith.constant 1 : index
    %c0_3 = arith.constant 0 : index
    %c0_4 = arith.constant 0 : index
    %c0_5 = arith.constant 0 : index
    %4 = vector.load %arg1[%c1, %c0_3, %c0_4, %c0_5] : memref<2x1x4x64xf32, #tpu.memory_space<vmem>>, vector<1x1x4x64xf32>
    %5 = vector.shape_cast %4 : vector<1x1x4x64xf32> to vector<4x64xf32>
    %cst_6 = arith.constant 0.000000e+00 : f32
    %6 = vector.broadcast %cst_6 : f32 to vector<4x64xf32>
    %7 = arith.maximumf %5, %6 : vector<4x64xf32>
    %c0_7 = arith.constant 0 : index
    %c0_8 = arith.constant 0 : index
    %c0_9 = arith.constant 0 : index
    %8 = vector.load %arg2[%c0_7, %c0_8, %c0_9] : memref<2x4x4xf32, #tpu.memory_space<vmem>>, vector<1x4x4xf32>
    %9 = vector.shape_cast %8 : vector<1x4x4xf32> to vector<4x4xf32>
    %cst_10 = arith.constant dense<0.000000e+00> : vector<4x64xf32>
    %10 = tpu.matmul %9, %3, %cst_10 {dimension_numbers = #tpu.dot_dimension_numbers<[1], [0], [0], [1], [0, 0, 1, 1], [], []>} : vector<4x4xf32>, vector<4x64xf32>, vector<4x64xf32> -> vector<4x64xf32>
    %c1_11 = arith.constant 1 : index
    %c0_12 = arith.constant 0 : index
    %c0_13 = arith.constant 0 : index
    %11 = vector.load %arg2[%c1_11, %c0_12, %c0_13] : memref<2x4x4xf32, #tpu.memory_space<vmem>>, vector<1x4x4xf32>
    %12 = vector.shape_cast %11 : vector<1x4x4xf32> to vector<4x4xf32>
    %cst_14 = arith.constant dense<0.000000e+00> : vector<4x64xf32>
    %13 = tpu.matmul %12, %7, %cst_14 {dimension_numbers = #tpu.dot_dimension_numbers<[1], [0], [0], [1], [0, 0, 1, 1], [], []>} : vector<4x4xf32>, vector<4x64xf32>, vector<4x64xf32> -> vector<4x64xf32>
    %cst_15 = arith.constant dense<0.000000e+00> : vector<4xf32>
    %14 = vector.multi_reduction <add>, %10, %cst_15 [1] : vector<4x64xf32> to vector<4xf32>
    %15 = vector.shape_cast %14 : vector<4xf32> to vector<4x1xf32>
    %cst_16 = arith.constant 1.562500e-02 : f32
    %16 = vector.broadcast %cst_16 : f32 to vector<4x1xf32>
    %17 = arith.mulf %15, %16 : vector<4x1xf32>
    %cst_17 = arith.constant dense<0.000000e+00> : vector<4xf32>
    %18 = vector.multi_reduction <add>, %13, %cst_17 [1] : vector<4x64xf32> to vector<4xf32>
    %19 = vector.shape_cast %18 : vector<4xf32> to vector<4x1xf32>
    %cst_18 = arith.constant 1.562500e-02 : f32
    %20 = vector.broadcast %cst_18 : f32 to vector<4x1xf32>
    %21 = arith.mulf %19, %20 : vector<4x1xf32>
    %22 = vector.broadcast %17 : vector<4x1xf32> to vector<4x64xf32>
    %23 = arith.subf %10, %22 : vector<4x64xf32>
    %24 = vector.broadcast %21 : vector<4x1xf32> to vector<4x64xf32>
    %25 = arith.subf %13, %24 : vector<4x64xf32>
    %c0_19 = arith.constant 0 : index
    %c0_20 = arith.constant 0 : index
    %c0_21 = arith.constant 0 : index
    %26 = vector.load %arg3[%c0_19, %c0_20, %c0_21] : memref<1x8x2xf32, #tpu.memory_space<vmem>>, vector<1x4x1xf32>
    %27 = vector.shape_cast %26 : vector<1x4x1xf32> to vector<4x1xf32>
    %28 = vector.shape_cast %17 : vector<4x1xf32> to vector<1x4x1xf32>
    tpu.vector_store %arg3[%c0_19, %c0_20, %c0_21], %28 {strides = array<i32>} : memref<1x8x2xf32, #tpu.memory_space<vmem>>, vector<1x4x1xf32>,
    %c0_22 = arith.constant 0 : index
    %c4 = arith.constant 4 : index
    %c0_23 = arith.constant 0 : index
    %29 = vector.load %arg3[%c0_22, %c4, %c0_23] : memref<1x8x2xf32, #tpu.memory_space<vmem>>, vector<1x4x1xf32>
    %30 = vector.shape_cast %29 : vector<1x4x1xf32> to vector<4x1xf32>
    %31 = vector.shape_cast %21 : vector<4x1xf32> to vector<1x4x1xf32>
    tpu.vector_store %arg3[%c0_22, %c4, %c0_23], %31 {strides = array<i32>} : memref<1x8x2xf32, #tpu.memory_space<vmem>>, vector<1x4x1xf32>,
    %32 = arith.mulf %23, %23 : vector<4x64xf32>
    %cst_24 = arith.constant dense<0.000000e+00> : vector<4xf32>
    %33 = vector.multi_reduction <add>, %32, %cst_24 [1] : vector<4x64xf32> to vector<4xf32>
    %34 = vector.shape_cast %33 : vector<4xf32> to vector<4x1xf32>
    %c0_25 = arith.constant 0 : index
    %c0_26 = arith.constant 0 : index
    %c1_27 = arith.constant 1 : index
    %35 = vector.load %arg3[%c0_25, %c0_26, %c1_27] : memref<1x8x2xf32, #tpu.memory_space<vmem>>, vector<1x4x1xf32>
    %36 = vector.shape_cast %35 : vector<1x4x1xf32> to vector<4x1xf32>
    %37 = vector.shape_cast %34 : vector<4x1xf32> to vector<1x4x1xf32>
    tpu.vector_store %arg3[%c0_25, %c0_26, %c1_27], %37 {strides = array<i32>} : memref<1x8x2xf32, #tpu.memory_space<vmem>>, vector<1x4x1xf32>,
    %38 = arith.mulf %25, %25 : vector<4x64xf32>
    %cst_28 = arith.constant dense<0.000000e+00> : vector<4xf32>
    %39 = vector.multi_reduction <add>, %38, %cst_28 [1] : vector<4x64xf32> to vector<4xf32>
    %40 = vector.shape_cast %39 : vector<4xf32> to vector<4x1xf32>
    %c0_29 = arith.constant 0 : index
    %c4_30 = arith.constant 4 : index
    %c1_31 = arith.constant 1 : index
    %41 = vector.load %arg3[%c0_29, %c4_30, %c1_31] : memref<1x8x2xf32, #tpu.memory_space<vmem>>, vector<1x4x1xf32>
    %42 = vector.shape_cast %41 : vector<1x4x1xf32> to vector<4x1xf32>
    %43 = vector.shape_cast %40 : vector<4x1xf32> to vector<1x4x1xf32>
    tpu.vector_store %arg3[%c0_29, %c4_30, %c1_31], %43 {strides = array<i32>} : memref<1x8x2xf32, #tpu.memory_space<vmem>>, vector<1x4x1xf32>,
    return
  }
  func.func @transform_0(%arg0: i32) -> (i32, i32, i32, i32) {
    %c0_i32 = arith.constant 0 : i32
    %c0_i32_0 = arith.constant 0 : i32
    %c0_i32_1 = arith.constant 0 : i32
    %c0_i32_2 = arith.constant 0 : i32
    return %c0_i32, %arg0, %c0_i32_0, %c0_i32_1 : i32, i32, i32, i32
  }
  func.func @transform_1(%arg0: i32) -> (i32, i32, i32) {
    %c0_i32 = arith.constant 0 : i32
    %c0_i32_0 = arith.constant 0 : i32
    %c0_i32_1 = arith.constant 0 : i32
    %c0_i32_2 = arith.constant 0 : i32
    return %c0_i32, %c0_i32_0, %c0_i32_1 : i32, i32, i32
  }
  func.func @transform_2(%arg0: i32) -> (i32, i32, i32) {
    %c0_i32 = arith.constant 0 : i32
    %c0_i32_0 = arith.constant 0 : i32
    %c0_i32_1 = arith.constant 0 : i32
    return %arg0, %c0_i32, %c0_i32_0 : i32, i32, i32
  }
}

module attributes {stable_mosaic.version = 11 : i64} {
  func.func @_conv_bn_kernel(%arg0: i32, %arg1: memref<2x1x4x64xf32, #tpu.memory_space<vmem>>, %arg2: memref<2x4x4xf32, #tpu.memory_space<vmem>>, %arg3: memref<2x4x1xf32, #tpu.memory_space<vmem>>, %arg4: memref<1x8x64xf32, #tpu.memory_space<vmem>>) attributes {dimension_semantics = [#tpu.dimension_semantics<parallel>], iteration_bounds = array<i64: 2>, scalar_prefetch = 0 : i64, scratch_operands = 0 : i64, tpu.core_type = #tpu.core_type<tc>, window_params = [{transform_indices = @transform_0, window_bounds = array<i64: 2, 1, 4, 64>}, {pipeline_mode = #tpu.pipeline_mode<synchronous>, transform_indices = @transform_1, window_bounds = array<i64: 2, 4, 4>}, {pipeline_mode = #tpu.pipeline_mode<synchronous>, transform_indices = @transform_2, window_bounds = array<i64: 2, 4, 1>}, {transform_indices = @transform_3, window_bounds = array<i64: 1, 8, 64>}]} {
    %c0 = arith.constant 0 : index
    %c0_0 = arith.constant 0 : index
    %c0_1 = arith.constant 0 : index
    %c0_2 = arith.constant 0 : index
    %0 = vector.load %arg1[%c0, %c0_0, %c0_1, %c0_2] : memref<2x1x4x64xf32, #tpu.memory_space<vmem>>, vector<1x1x4x64xf32>
    %1 = vector.shape_cast %0 : vector<1x1x4x64xf32> to vector<4x64xf32>
    %cst = arith.constant 0.000000e+00 : f32
    %2 = vector.broadcast %cst : f32 to vector<4x64xf32>
    %3 = arith.maximumf %1, %2 : vector<4x64xf32>
    %c1 = arith.constant 1 : index
    %c0_3 = arith.constant 0 : index
    %c0_4 = arith.constant 0 : index
    %c0_5 = arith.constant 0 : index
    %4 = vector.load %arg1[%c1, %c0_3, %c0_4, %c0_5] : memref<2x1x4x64xf32, #tpu.memory_space<vmem>>, vector<1x1x4x64xf32>
    %5 = vector.shape_cast %4 : vector<1x1x4x64xf32> to vector<4x64xf32>
    %cst_6 = arith.constant 0.000000e+00 : f32
    %6 = vector.broadcast %cst_6 : f32 to vector<4x64xf32>
    %7 = arith.maximumf %5, %6 : vector<4x64xf32>
    %c0_7 = arith.constant 0 : index
    %c0_8 = arith.constant 0 : index
    %c0_9 = arith.constant 0 : index
    %8 = vector.load %arg2[%c0_7, %c0_8, %c0_9] : memref<2x4x4xf32, #tpu.memory_space<vmem>>, vector<1x4x4xf32>
    %9 = vector.shape_cast %8 : vector<1x4x4xf32> to vector<4x4xf32>
    %cst_10 = arith.constant dense<0.000000e+00> : vector<4x64xf32>
    %10 = tpu.matmul %9, %3, %cst_10 {dimension_numbers = #tpu.dot_dimension_numbers<[1], [0], [0], [1], [0, 0, 1, 1], [], []>} : vector<4x4xf32>, vector<4x64xf32>, vector<4x64xf32> -> vector<4x64xf32>
    %c0_11 = arith.constant 0 : index
    %c0_12 = arith.constant 0 : index
    %c0_13 = arith.constant 0 : index
    %11 = vector.load %arg3[%c0_11, %c0_12, %c0_13] : memref<2x4x1xf32, #tpu.memory_space<vmem>>, vector<1x4x1xf32>
    %12 = vector.shape_cast %11 : vector<1x4x1xf32> to vector<4x1xf32>
    %13 = vector.broadcast %12 : vector<4x1xf32> to vector<4x64xf32>
    %14 = arith.addf %10, %13 : vector<4x64xf32>
    %c0_14 = arith.constant 0 : index
    %c0_15 = arith.constant 0 : index
    %c0_16 = arith.constant 0 : index
    %15 = vector.load %arg4[%c0_14, %c0_15, %c0_16] : memref<1x8x64xf32, #tpu.memory_space<vmem>>, vector<1x4x64xf32>
    %16 = vector.shape_cast %15 : vector<1x4x64xf32> to vector<4x64xf32>
    %17 = vector.shape_cast %14 : vector<4x64xf32> to vector<1x4x64xf32>
    tpu.vector_store %arg4[%c0_14, %c0_15, %c0_16], %17 {strides = array<i32>} : memref<1x8x64xf32, #tpu.memory_space<vmem>>, vector<1x4x64xf32>,
    %c1_17 = arith.constant 1 : index
    %c0_18 = arith.constant 0 : index
    %c0_19 = arith.constant 0 : index
    %18 = vector.load %arg2[%c1_17, %c0_18, %c0_19] : memref<2x4x4xf32, #tpu.memory_space<vmem>>, vector<1x4x4xf32>
    %19 = vector.shape_cast %18 : vector<1x4x4xf32> to vector<4x4xf32>
    %cst_20 = arith.constant dense<0.000000e+00> : vector<4x64xf32>
    %20 = tpu.matmul %19, %7, %cst_20 {dimension_numbers = #tpu.dot_dimension_numbers<[1], [0], [0], [1], [0, 0, 1, 1], [], []>} : vector<4x4xf32>, vector<4x64xf32>, vector<4x64xf32> -> vector<4x64xf32>
    %c1_21 = arith.constant 1 : index
    %c0_22 = arith.constant 0 : index
    %c0_23 = arith.constant 0 : index
    %21 = vector.load %arg3[%c1_21, %c0_22, %c0_23] : memref<2x4x1xf32, #tpu.memory_space<vmem>>, vector<1x4x1xf32>
    %22 = vector.shape_cast %21 : vector<1x4x1xf32> to vector<4x1xf32>
    %23 = vector.broadcast %22 : vector<4x1xf32> to vector<4x64xf32>
    %24 = arith.addf %20, %23 : vector<4x64xf32>
    %c0_24 = arith.constant 0 : index
    %c4 = arith.constant 4 : index
    %c0_25 = arith.constant 0 : index
    %25 = vector.load %arg4[%c0_24, %c4, %c0_25] : memref<1x8x64xf32, #tpu.memory_space<vmem>>, vector<1x4x64xf32>
    %26 = vector.shape_cast %25 : vector<1x4x64xf32> to vector<4x64xf32>
    %27 = vector.shape_cast %24 : vector<4x64xf32> to vector<1x4x64xf32>
    tpu.vector_store %arg4[%c0_24, %c4, %c0_25], %27 {strides = array<i32>} : memref<1x8x64xf32, #tpu.memory_space<vmem>>, vector<1x4x64xf32>,
    return
  }
  func.func @transform_0(%arg0: i32) -> (i32, i32, i32, i32) {
    %c0_i32 = arith.constant 0 : i32
    %c0_i32_0 = arith.constant 0 : i32
    %c0_i32_1 = arith.constant 0 : i32
    %c0_i32_2 = arith.constant 0 : i32
    return %c0_i32, %arg0, %c0_i32_0, %c0_i32_1 : i32, i32, i32, i32
  }
  func.func @transform_1(%arg0: i32) -> (i32, i32, i32) {
    %c0_i32 = arith.constant 0 : i32
    %c0_i32_0 = arith.constant 0 : i32
    %c0_i32_1 = arith.constant 0 : i32
    %c0_i32_2 = arith.constant 0 : i32
    return %c0_i32, %c0_i32_0, %c0_i32_1 : i32, i32, i32
  }
  func.func @transform_2(%arg0: i32) -> (i32, i32, i32) {
    %c0_i32 = arith.constant 0 : i32
    %c0_i32_0 = arith.constant 0 : i32
    %c0_i32_1 = arith.constant 0 : i32
    %c0_i32_2 = arith.constant 0 : i32
    return %c0_i32, %c0_i32_0, %c0_i32_1 : i32, i32, i32
  }
  func.func @transform_3(%arg0: i32) -> (i32, i32, i32) {
    %c0_i32 = arith.constant 0 : i32
    %c0_i32_0 = arith.constant 0 : i32
    %c0_i32_1 = arith.constant 0 : i32
    return %arg0, %c0_i32, %c0_i32_0 : i32, i32, i32
  }
}

</mosaic_0001>

<bundles_post_ra>
// kernel: mul.11
= control target key start
LH: loop header
LB: loop body
LE: loop exit
PB: predicated region body
PF: predicated region fallthrough
CT: control target
= control target key end

     0   :  { %vm7_vm0 = vcmask 31744   ;;  %s39_s0 = inlined_call_operand.vmem [shape: f32[8], index: 0, kind: input, shape index: {}]   ;;  %s40_s1 = inlined_call_operand.vmem [shape: f32[2,4], index: 1, kind: output, shape index: {}]  }
   0x1   :  { %v4_v0 = vld [vmem:[%s39_s0] sm:$0x1]  ;;  %s22_s0 = smov 124  }
   0x2   :  { %5 = vst [vmem:[#allocation1] sm:$0x1] %v4_v0 }
   0x9   :  { %v9_v1 = vld [vmem:[#allocation1] sm:$0x1]  }
   0xa   :  { %v6_v2 = vld [vmem:[#allocation1] sm:$0x1]   ;;  %10 = vrot.lane.b32.xlu0 %v9_v1, %s22_s0 }
   0xb   :  { %8 = vst.msk [vmem:[#allocation0] sm:$0x1] %vm7_vm0, %v6_v2  }
  0x7c   :  { %v11_v3 = vpop.permute.xlu0 %10  }
  0x7d   :  { %14 = vst.msk [vmem:[#allocation0 + $0x1] sm:$0x1] %vm7_vm0, %v11_v3  }
  0x84   :  { %v18_v4 = vld [vmem:[#allocation0] sm:$0x3] }
  0x85   :  { %20 = vst [vmem:[%s40_s1] sm:$0x3] %v18_v4 }

// kernel: factorized_reduce.2
= control target key start
LH: loop header
LB: loop body
LE: loop exit
PB: predicated region body
PF: predicated region fallthrough
CT: control target
= control target key end

     0   :  { %s531_s9 = smov 0   ;;  %s533_s10 = smov 0   ;;  %s595_s0 = inlined_call_operand.vmem [shape: f32[2,2,4,64], index: 0, kind: input, shape index: {}]   ;;  %s596_s1 = inlined_call_operand.vmem [shape: f32[2,4,4], index: 1, kind: input, shape index: {}]   ;;  %s597_s2 = inlined_call_operand.vmem [shape: f32[2,8,2], index: 2, kind: output, shape index: {}]  }
   0x1   :  { %s535_s11 = smov 0  }
   0x2 LB: > { %s433_s12 = sadd.s32 4294967295, %s512_s11   ;;  %s548_s13 = sadd.s32 1, %s512_s11   ;;  %s512_s11 = sphi %s535_s11, %s600_s11   ;;  %s508_s10 = sphi %s533_s10, %s599_s10   ;;  %s504_s9 = sphi %s531_s9, %s598_s9  }
   0x3   : > { %s16_s14 = ssub.s32 %s512_s11, %s548_s13  ;;  %s19_s15 = sadd.s32 1, %s508_s10 }
   0x4   : > { %p17_p0 = scmp.eq.s32.totalorder %s16_s14, 0  ;;  %p26_p1 = scmp.ne.s32.totalorder %s508_s10, %s504_s9 }
   0x5   : > { %p27_p2 = scmp.eq.s32.totalorder %s512_s11, 0  ;;  %p436_p4 = scmp.ge.s32.totalorder %s512_s11, 2 }
   0x6   : > { %s557_s16 = scalar_select %p17_p0, %s508_s10, %s19_s15  }
   0x7   : > { %p28_p3 = por %p27_p2, %p26_p1  ;;  %102 = sbr.rel (%p436_p4) target bundleno = 21 (0x15), region = 20 }
   0xe   : > { %105 = sbr.rel (!%p28_p3) target bundleno = 21 (0x15), region = 24  ;;  %s107_s17 = sand.u32 (%p28_p3), 1, %s508_s10  }
   0xf   : > { %s438_s18 = sshll.u32 (%p28_p3), %s512_s11, 2  ;;  %s437_s19 = sshll.u32 (%p28_p3), %s107_s17, 3 }
  0x10   : > { %s111_s22 = scalar_lea.vmem (%p28_p3), %s595_s0, %s438_s18  ;;  %s109_s23 = scalar_lea.vmem (%p28_p3), [#allocation2], %s437_s19 }
  0x11   : > { %v127_v0 = vld [vmem:[%s111_s22] sm:$0xf] (%p28_p3)  ;;  %v129_v1 = vld [vmem:[%s111_s22 + $0x8] sm:$0xf] (%p28_p3) }
  0x12   : > { %128 = vst [vmem:[%s109_s23] sm:$0xf] (%p28_p3), %v127_v0  ;;  %130 = vst [vmem:[%s109_s23 + $0x4] sm:$0xf] (%p28_p3), %v129_v1 }
  0x15 PF: > { %p439_p5 = scmp.ge.s32.totalorder %s512_s11, 1  ;;  %p156_p6 = scmp.lt.s32.totalorder %s512_s11, 3 }
  0x17   : > { %p157_p7 = pnand %p439_p5, %p156_p6 }
  0x18   : > { %s163_s24 = sand.u32 (!%p157_p7), 1, %s504_s9   ;;  %v514_v2 = vmov (!%p157_p7), 0.0   ;;  %vm515_vm0 = vmmov (!%p157_p7), 0   ;;  %vm197_vm1 = vcmask (!%p157_p7), 1043456   ;;  %v192_v4 = vld [vmem:[%s596_s1] sm:$0xf] (!%p157_p7) }
  0x19   : > { %160 = sbr.rel (%p157_p7) target bundleno = 540 (0x21c), region = 65  ;;  %454 = vmatprep.subr.mxu0 (!%p157_p7), %v514_v2  ;;  %s440_s25 = sshll.u32 (!%p157_p7), %s163_s24, 3  ;;  %456 = vmatprep.mubr.msk.f32.mxu0 (!%p157_p7), %vm515_vm0, %v514_v2  ;;  %vm193_vm2 = vcmask (!%p157_p7), 31744   ;;  %v445_v8 = vld [vmem:[%s596_s1 + $0x4] sm:$0xf] (!%p157_p7)  ;;  %vm349_vm3 = vcmask (!%p157_p7), 519168  }
  0x1a   : > { %459 = vmatprep.subr.mxu1 (!%p157_p7), %v514_v2  ;;  %461 = vmatprep.mubr.msk.f32.mxu1 (!%p157_p7), %vm515_vm0, %v514_v2  ;;  %s165_s26 = scalar_lea.vmem (!%p157_p7), [#allocation2], %s440_s25  ;;  %p183_p8 = scmp.lt.s32.totalorder (!%p157_p7), %s433_s12, 1  ;;  %vm360_vm4 = vcmask (!%p157_p7), 3072   ;;  %vm367_vm5 = vcmask (!%p157_p7), 11272  }
  0x1b   : > { %v187_v3 = vld [vmem:[%s165_s26] sm:$0xf] (!%p157_p7)  ;;  %v442_v5 = vld [vmem:[%s165_s26 + $0x4] sm:$0xf] (!%p157_p7) }
  0x1c   : > { %v188_v6 = vmax.f32 (!%p157_p7), %v187_v3, 0.0  ;;  %v191_v7 = vmax.f32 (!%p157_p7), %v442_v5, 0.0 }
  0x1e   : > { %455 = vmatpush3.msk.msra.mxu0 (!%p157_p7), %vm197_vm1, %v188_v6  ;;  %460 = vmatpush3.msk.msra.mxu1 (!%p157_p7), %vm197_vm1, %v191_v7 }
  0x1f   : > { %457 = vmatmul.mubr.msk.f32.vlgmr.msra.gmra.mrb[0].mxu0 (!%p157_p7), %vm193_vm2, %v192_v4  ;;  %462 = vmatmul.mubr.msk.f32.vlgmr.msra.gmra.mrb[0].mxu1 (!%p157_p7), %vm193_vm2, %v445_v8 }
  0x20   : > { %s602_s12 = smov (!%p183_p8, %s433_s12), 1 }
  0x21   : > { %s441_s3 = sshll.u32 %s602_s12, 3 }
  0x22   : > { %s186_s6 = scalar_lea.vmem %s597_s2, %s441_s3 }
  0xf2   : > { %v267_v9 = vpop.f32.mrb[0].mxu0  ;;  %v345_v10 = vpop.f32.mrb[0].mxu1 }
  0xf3   : > { %v458_v11 = vpop.f32.mrb[1].mxu0  ;;  %v350_v12 = vsel %vm349_vm3, %v267_v9, 0.0  ;;  %v463_v13 = vpop.f32.mrb[1].mxu1  ;;  %v354_v14 = vsel %vm349_vm3, %v345_v10, 0.0 }
  0xf4   : > { %351 = vadd.xlane.f32.xlu0 %v350_v12 }
  0xf8   : > { %355 = vadd.xlane.f32.xlu0 %v354_v14 }
 0x181   : > { %v352_v15 = vpop.xlane.xlu0 %351 }
 0x182   : > { %v353_v16 = vmul.f32 0.015625, %v352_v15 }
 0x184   : > { %361 = vst.msk [vmem:[%s186_s6] sm:$0xf] %vm360_vm4, %v353_v16  ;;  %v358_v17 = vsub.f32 %v267_v9, %v353_v16 }
 0x185   : > { %v356_v18 = vpop.xlane.xlu0 %355 }
 0x186   : > { %v357_v19 = vmul.f32 0.015625, %v356_v18  ;;  %v363_v20 = vmul.f32 %v358_v17, %v358_v17 }
 0x188   : > { %v359_v21 = vsub.f32 %v345_v10, %v357_v19  ;;  %362 = vst.msk [vmem:[%s186_s6 + $0x4] sm:$0xf] %vm360_vm4, %v357_v19  ;;  %v364_v22 = vsel %vm349_vm3, %v363_v20, 0.0 }
 0x189   : > { %365 = vadd.xlane.f32.xlu1 %v364_v22 }
 0x18a   : > { %v369_v23 = vmul.f32 %v359_v21, %v359_v21 }
 0x18c   : > { %v370_v24 = vsel %vm349_vm3, %v369_v23, 0.0 }
 0x18d   : > { %371 = vadd.xlane.f32.xlu1 %v370_v24 }
 0x216   : > { %v366_v25 = vpop.xlane.xlu1 %365 }
 0x217   : > { %368 = vst.msk [vmem:[%s186_s6] sm:$0xf] %vm367_vm5, %v366_v25 }
 0x21a   : > { %v372_v26 = vpop.xlane.xlu1 %371 }
 0x21b   : > { %373 = vst.msk [vmem:[%s186_s6 + $0x4] sm:$0xf] %vm367_vm5, %v372_v26 }
 0x21c PF: > { %p9_p9 = scmp.ge.s32.totalorder %s548_s13, 4   ;;  %s598_s9 = smov %s508_s10 }
 0x21d   : > { %s599_s10 = smov %s557_s16  ;;  %s600_s11 = smov %s548_s13 }
 0x21e   :  { %11 = sbr.rel (!%p9_p9) target bundleno = 2 (0x2), region = 106 }

// kernel: factorized_reduce.3
= control target key start
LH: loop header
LB: loop body
LE: loop exit
PB: predicated region body
PF: predicated region fallthrough
CT: control target
= control target key end

     0   :  { %s558_s12 = smov 0   ;;  %s560_s13 = smov 0   ;;  %s626_s0 = inlined_call_operand.vmem [shape: f32[2,2,4,64], index: 0, kind: input, shape index: {}]   ;;  %s627_s1 = inlined_call_operand.vmem [shape: f32[2,4,4], index: 1, kind: input, shape index: {}]   ;;  %s628_s2 = inlined_call_operand.vmem [shape: f32[2,4,1], index: 2, kind: input, shape index: {}]   ;;  %s629_s3 = inlined_call_operand.vmem [shape: f32[2,8,64], index: 3, kind: output, shape index: {}]  }
   0x1   :  { %s562_s14 = smov 0  }
   0x2 LB: > { %s451_s15 = sadd.s32 4294967295, %s533_s14   ;;  %s575_s16 = sadd.s32 1, %s533_s14   ;;  %s533_s14 = sphi %s562_s14, %s632_s14   ;;  %s529_s13 = sphi %s560_s13, %s631_s13   ;;  %s525_s12 = sphi %s558_s12, %s630_s12  }
   0x3   : > { %s17_s17 = ssub.s32 %s533_s14, %s575_s16  ;;  %s20_s18 = sadd.s32 1, %s529_s13 }
   0x4   : > { %p18_p0 = scmp.eq.s32.totalorder %s17_s17, 0  ;;  %p27_p1 = scmp.ne.s32.totalorder %s529_s13, %s525_s12 }
   0x5   : > { %p28_p2 = scmp.eq.s32.totalorder %s533_s14, 0  ;;  %p454_p4 = scmp.ge.s32.totalorder %s533_s14, 2 }
   0x6   : > { %s584_s19 = scalar_select %p18_p0, %s529_s13, %s20_s18  }
   0x7   : > { %p29_p3 = por %p28_p2, %p27_p1  ;;  %127 = sbr.rel (%p454_p4) target bundleno = 21 (0x15), region = 24 }
   0xe   : > { %130 = sbr.rel (!%p29_p3) target bundleno = 21 (0x15), region = 28  ;;  %s132_s20 = sand.u32 (%p29_p3), 1, %s529_s13  }
   0xf   : > { %s456_s21 = sshll.u32 (%p29_p3), %s533_s14, 2  ;;  %s455_s22 = sshll.u32 (%p29_p3), %s132_s20, 3 }
  0x10   : > { %s136_s25 = scalar_lea.vmem (%p29_p3), %s626_s0, %s456_s21  ;;  %s134_s26 = scalar_lea.vmem (%p29_p3), [#allocation2], %s455_s22 }
  0x11   : > { %v152_v0 = vld [vmem:[%s136_s25] sm:$0xf] (%p29_p3)  ;;  %v154_v1 = vld [vmem:[%s136_s25 + $0x8] sm:$0xf] (%p29_p3) }
  0x12   : > { %153 = vst [vmem:[%s134_s26] sm:$0xf] (%p29_p3), %v152_v0  ;;  %155 = vst [vmem:[%s134_s26 + $0x4] sm:$0xf] (%p29_p3), %v154_v1 }
  0x15 PF: > { %p457_p5 = scmp.ge.s32.totalorder %s533_s14, 1  ;;  %p181_p6 = scmp.lt.s32.totalorder %s533_s14, 3 }
  0x17   : > { %p182_p7 = pnand %p457_p5, %p181_p6 }
  0x18   : > { %s188_s27 = sand.u32 (!%p182_p7), 1, %s525_s12   ;;  %v535_v2 = vmov (!%p182_p7), 0.0   ;;  %vm230_vm0 = vcmask (!%p182_p7), 1043456   ;;  %vm536_vm1 = vmmov (!%p182_p7), 0   ;;  %v220_v3 = vld [vmem:[%s628_s2] sm:$0xf] (!%p182_p7) }
  0x19   : > { %185 = sbr.rel (%p182_p7) target bundleno = 246 (0xf6), region = 69  ;;  %473 = vmatprep.subr.mxu0 (!%p182_p7), %v535_v2  ;;  %478 = vmatprep.subr.mxu1 (!%p182_p7), %v535_v2  ;;  %s458_s28 = sshll.u32 (!%p182_p7), %s188_s27, 3  ;;  %v219_v6 = vld [vmem:[%s627_s1] sm:$0xf] (!%p182_p7)  ;;  %v537_v7 = vmov (!%p182_p7), 0   ;;  %vm226_vm2 = vcmask (!%p182_p7), 31744  }
  0x1a   : > { %475 = vmatprep.mubr.msk.f32.mxu0 (!%p182_p7), %vm536_vm1, %v535_v2  ;;  %480 = vmatprep.mubr.msk.f32.mxu1 (!%p182_p7), %vm536_vm1, %v535_v2  ;;  %s190_s4 = scalar_lea.vmem (!%p182_p7), [#allocation2], %s458_s28  ;;  %v463_v10 = vld [vmem:[%s627_s1 + $0x4] sm:$0xf] (!%p182_p7)  ;;  %p210_p8 = scmp.lt.s32.totalorder (!%p182_p7), %s451_s15, 1  ;;  %vm304_vm3 = vcmask (!%p182_p7), 519168  }
  0x1b   : > { %v214_v4 = vld [vmem:[%s190_s4] sm:$0xf] (!%p182_p7)  ;;  %v460_v5 = vld [vmem:[%s190_s4 + $0x4] sm:$0xf] (!%p182_p7)  ;;  %510 = vset.pattern.permute.xlu0 (!%p182_p7), %v537_v7 }
  0x1c   : > { %v215_v8 = vmax.f32 (!%p182_p7), %v214_v4, 0.0  ;;  %v218_v9 = vmax.f32 (!%p182_p7), %v460_v5, 0.0  ;;  %223 = vperm.xlu0 (!%p182_p7), %510, %v220_v3   ;;  %v464_v11 = vld [vmem:[%s628_s2 + $0x4] sm:$0xf] (!%p182_p7) }
  0x1e   : > { %474 = vmatpush3.msk.msra.mxu0 (!%p182_p7), %vm230_vm0, %v215_v8  ;;  %479 = vmatpush3.msk.msra.mxu1 (!%p182_p7), %vm230_vm0, %v218_v9 }
  0x1f   : > { %476 = vmatmul.mubr.msk.f32.vlgmr.msra.gmra.mrb[0].mxu0 (!%p182_p7), %vm226_vm2, %v219_v6  ;;  %481 = vmatmul.mubr.msk.f32.vlgmr.msra.gmra.mrb[0].mxu1 (!%p182_p7), %vm226_vm2, %v463_v10 }
  0x20   : > { %312 = vperm.xlu0 %510, %v464_v11   ;;  %s634_s15 = smov (!%p210_p8, %s451_s15), 1 }
  0x21   : > { %s459_s11 = sshll.u32 %s634_s15, 3 }
  0x22   : > { %s213_s18 = scalar_lea.vmem %s629_s3, %s459_s11 }
  0x9b   : > { %v224_v12 = vpop.permute.xlu0 %223 }
  0x9f   : > { %v313_v13 = vpop.permute.xlu0 %312 }
  0xf2   : > { %v300_v14 = vpop.f32.mrb[0].mxu0  ;;  %v387_v15 = vpop.f32.mrb[0].mxu1 }
  0xf3   : > { %v301_v16 = vadd.f32 %v300_v14, %v224_v12  ;;  %v388_v17 = vadd.f32 %v387_v15, %v313_v13  ;;  %v477_v18 = vpop.f32.mrb[1].mxu0  ;;  %v482_v19 = vpop.f32.mrb[1].mxu1 }
  0xf5   : > { %305 = vst.msk [vmem:[%s213_s18] sm:$0xf] %vm304_vm3, %v301_v16  ;;  %391 = vst.msk [vmem:[%s213_s18 + $0x4] sm:$0xf] %vm304_vm3, %v388_v17 }
  0xf6 PF: > { %p10_p9 = scmp.ge.s32.totalorder %s575_s16, 4   ;;  %s630_s12 = smov %s529_s13 }
  0xf7   : > { %s631_s13 = smov %s584_s19  ;;  %s632_s14 = smov %s575_s16 }
  0xf8   :  { %12 = sbr.rel (!%p10_p9) target bundleno = 2 (0x2), region = 111 }

</bundles_post_ra>
